<compile_context>
chip_gen: v7x
topology: tpu7x:2x2x1
jax: 0.10.0
libtpu: 0.0.40
codegen_flags: <defaults>
</compile_context>

<pallas_src>
import functools

import jax
import jax.numpy as jnp
from jax.experimental import pallas as pl
from jax.experimental.pallas import tpu as pltpu


def _reglog_kernel(x_ref, wt_ref, b_ref, o_ref):
    """out_tile = x_tile @ Wt + b  (bf16 operands, f32 MXU accumulate)."""
    o_ref[...] = (
        jnp.dot(x_ref[...], wt_ref[...], preferred_element_type=jnp.float32)
        + b_ref[...]
    ).astype(o_ref.dtype)


def prepare_params(weight, bias, param_dtype=jnp.bfloat16):
    """One-time parameter prep (hoisted out of the per-call forward path).

    weight: (num_labels, 2048) -> (2048, num_labels), cast to param_dtype.
    bias:   (num_labels,)      -> (1, num_labels) f32 (added after accumulate).
    """
    wt = jnp.asarray(weight).T.astype(param_dtype)
    b2d = jnp.asarray(bias).reshape(1, -1).astype(jnp.float32)
    return wt, b2d


@functools.partial(jax.jit, static_argnames=("block_b",))
def reglog_forward(x, wt, b2d, *, block_b=256):
    """x: (B, 2048), wt: (2048, N) prepped weight, b2d: (1, N) f32 bias."""
    B, K = x.shape
    Kw, N = wt.shape
    assert K == Kw, (K, Kw)

    # Batch tile: whole (8-rounded) batch when small, otherwise block_b rows
    # per grid step.  A 256x2048 bf16 x-tile is 1 MiB (2 MiB double-buffered)
    # plus the resident 2048xN bf16 weight — comfortably inside even v7x's
    # 32 MiB default-scoped VMEM, so no vmem_limit_bytes override is needed.
    if B <= block_b:
        tm = ((B + 7) // 8) * 8
    else:
        tm = block_b
    Bp = ((B + tm - 1) // tm) * tm

    # Per-call work on x only: cast to the streaming dtype in the wrapper
    # (not inside the kernel) and zero-pad the batch to the tile boundary.
    x_c = x.astype(wt.dtype)
    if Bp != B:
        x_c = jnp.zeros((Bp, K), x_c.dtype).at[:B, :].set(x_c)

    out = pl.pallas_call(
        _reglog_kernel,
        out_shape=jax.ShapeDtypeStruct((Bp, N), jnp.float32),
        grid_spec=pltpu.PrefetchScalarGridSpec(
            num_scalar_prefetch=0,
            grid=(Bp // tm,),
            in_specs=[
                pl.BlockSpec((tm, K), lambda i: (i, 0)),  # x batch tile
                pl.BlockSpec((K, N), lambda i: (0, 0)),   # full weight, resident
                pl.BlockSpec((1, N), lambda i: (0, 0)),   # bias, resident
            ],
            out_specs=pl.BlockSpec((tm, N), lambda i: (i, 0)),
        ),
        compiler_params=pltpu.CompilerParams(
            dimension_semantics=("parallel",),  # batch axis -> both TCs on v7x
        ),
    )(x_c, wt, b2d)

    return out[:B, :N]


if __name__ == "__main__":
    num_labels = 16
    batch = 2
    in_features = 2048  # fixed by the module

    key = jax.random.PRNGKey(0)
    kx, kw = jax.random.split(key)

    # Deterministic parameter init matching the module's __init__:
    # weight ~ N(0, 0.01), bias filled with 0.1.
    weight = 0.01 * jax.random.normal(kw, (num_labels, in_features), jnp.float32)
    bias = jnp.full((num_labels,), 0.1, jnp.float32)
    x = jax.random.normal(kx, (batch, in_features), jnp.float32)

    # One-time parameter prep (transpose + bf16 cast), outside the forward path.
    wt, b2d = prepare_params(weight, bias)

    out = reglog_forward(x, wt, b2d)
    out = jax.block_until_ready(out)

    assert out.shape == (batch, num_labels)

    # Check against the original f32 module semantics (bf16 streaming with f32
    # accumulation keeps error ~1e-3 for this 2048-deep reduction).
    ref_f32 = x @ weight.T + bias
    assert jnp.allclose(out, ref_f32, atol=3e-2, rtol=3e-2)

    # Matched-precision reference (same bf16 operands, f32 accumulate).
    ref_matched = (
        jnp.dot(x.astype(jnp.bfloat16), wt, preferred_element_type=jnp.float32)
        + b2d
    )
    assert jnp.allclose(out, ref_matched, atol=1e-3, rtol=1e-3)

    print("KERNEL_OK")
</pallas_src>

<mosaic_0001>
module attributes {stable_mosaic.version = 11 : i64} {
  func.func @_reglog_kernel(%arg0: i32, %arg1: memref<8x2048xbf16, #tpu.memory_space<vmem>>, %arg2: memref<2048x16xbf16, #tpu.memory_space<vmem>>, %arg3: memref<1x16xf32, #tpu.memory_space<vmem>>, %arg4: memref<8x16xf32, #tpu.memory_space<vmem>>) attributes {dimension_semantics = [#tpu.dimension_semantics<parallel>], iteration_bounds = array<i64: 1>, scalar_prefetch = 0 : i64, scratch_operands = 0 : i64, tpu.core_type = #tpu.core_type<tc>, window_params = [{transform_indices = @transform_0, window_bounds = array<i64: 8, 2048>}, {pipeline_mode = #tpu.pipeline_mode<synchronous>, transform_indices = @transform_1, window_bounds = array<i64: 2048, 16>}, {pipeline_mode = #tpu.pipeline_mode<synchronous>, transform_indices = @transform_2, window_bounds = array<i64: 1, 16>}, {transform_indices = @transform_3, window_bounds = array<i64: 8, 16>}]} {
    %c0 = arith.constant 0 : index
    %c0_0 = arith.constant 0 : index
    %0 = vector.load %arg1[%c0, %c0_0] : memref<8x2048xbf16, #tpu.memory_space<vmem>>, vector<8x2048xbf16>
    %c0_1 = arith.constant 0 : index
    %c0_2 = arith.constant 0 : index
    %1 = vector.load %arg2[%c0_1, %c0_2] : memref<2048x16xbf16, #tpu.memory_space<vmem>>, vector<2048x16xbf16>
    %cst = arith.constant dense<0.000000e+00> : vector<8x16xf32>
    %2 = tpu.matmul %0, %1, %cst {dimension_numbers = #tpu.dot_dimension_numbers<[1], [0], [0], [1], [0, 0, 1, 1], [], []>} : vector<8x2048xbf16>, vector<2048x16xbf16>, vector<8x16xf32> -> vector<8x16xf32>
    %c0_3 = arith.constant 0 : index
    %c0_4 = arith.constant 0 : index
    %3 = vector.load %arg3[%c0_3, %c0_4] : memref<1x16xf32, #tpu.memory_space<vmem>>, vector<1x16xf32>
    %4 = vector.broadcast %3 : vector<1x16xf32> to vector<8x16xf32>
    %5 = arith.addf %2, %4 : vector<8x16xf32>
    %c0_5 = arith.constant 0 : index
    %c0_6 = arith.constant 0 : index
    %6 = vector.load %arg4[%c0_5, %c0_6] : memref<8x16xf32, #tpu.memory_space<vmem>>, vector<8x16xf32>
    tpu.vector_store %arg4[%c0_5, %c0_6], %5 {strides = array<i32>} : memref<8x16xf32, #tpu.memory_space<vmem>>, vector<8x16xf32>,
    return
  }
  func.func @transform_0(%arg0: i32) -> (i32, i32) {
    %c0_i32 = arith.constant 0 : i32
    %c0_i32_0 = arith.constant 0 : i32
    return %arg0, %c0_i32 : i32, i32
  }
  func.func @transform_1(%arg0: i32) -> (i32, i32) {
    %c0_i32 = arith.constant 0 : i32
    %c0_i32_0 = arith.constant 0 : i32
    %c0_i32_1 = arith.constant 0 : i32
    return %c0_i32, %c0_i32_0 : i32, i32
  }
  func.func @transform_2(%arg0: i32) -> (i32, i32) {
    %c0_i32 = arith.constant 0 : i32
    %c0_i32_0 = arith.constant 0 : i32
    %c0_i32_1 = arith.constant 0 : i32
    return %c0_i32, %c0_i32_0 : i32, i32
  }
  func.func @transform_3(%arg0: i32) -> (i32, i32) {
    %c0_i32 = arith.constant 0 : i32
    %c0_i32_0 = arith.constant 0 : i32
    return %arg0, %c0_i32 : i32, i32
  }
}

</mosaic_0001>

<bundles_post_ra>
// kernel: reglog_forward.1
= control target key start
LH: loop header
LB: loop body
LE: loop exit
PB: predicated region body
PF: predicated region fallthrough
CT: control target
= control target key end

     0   :  { %vm1430_vm0 = vcmask 130048   ;;  %s2335_s1 = inlined_call_operand.vmem [shape: bf16[2048,16], index: 1, kind: input, shape index: {}]   ;;  %s2336_s0 = inlined_call_operand.vmem [shape: bf16[8,2048], index: 0, kind: input, shape index: {}]   ;;  %s2337_s2 = inlined_call_operand.vmem [shape: f32[1,16], index: 2, kind: input, shape index: {}]   ;;  %s2338_s3 = inlined_call_operand.vmem [shape: f32[8,16], index: 3, kind: output, shape index: {}]  }
   0x1   :  { %v1757_v0 = vld [vmem:[%s2335_s1 + $0x40] sm:$0xff]   ;;  %v1761_v4 = vld [vmem:[%s2335_s1 + $0x48] sm:$0xff]   ;;  %v1765_v8 = vld [vmem:[%s2335_s1 + $0x50] sm:$0xff]  }
   0x2   :  { %v1758_v1 = vld [vmem:[%s2335_s1 + $0xc0] sm:$0xff]   ;;  %1581 = vmatprep.subr.bf16.mxu0 %v1757_v0  ;;  %v1762_v5 = vld [vmem:[%s2335_s1 + $0xc8] sm:$0xff]   ;;  %v1766_v9 = vld [vmem:[%s2335_s1 + $0xd0] sm:$0xff]  }
   0x3   :  { %v1759_v2 = vld [vmem:[%s2335_s1] sm:$0xff]   ;;  %1603 = vmatprep.subr.bf16.mxu1 %v1758_v1  ;;  %v1763_v6 = vld [vmem:[%s2335_s1 + $0x8] sm:$0xff]   ;;  %v1767_v10 = vld [vmem:[%s2335_s1 + $0x10] sm:$0xff]  }
   0x4   :  { %v1760_v3 = vld [vmem:[%s2335_s1 + $0x80] sm:$0xff]   ;;  %1582 = vmatpush3.bf16.msra.mxu0 %v1759_v2  ;;  %v1764_v7 = vld [vmem:[%s2335_s1 + $0x88] sm:$0xff]   ;;  %v1768_v11 = vld [vmem:[%s2335_s1 + $0x90] sm:$0xff]  }
   0x5   :  { %1604 = vmatpush3.bf16.msra.mxu1 %v1760_v3  ;;  %1583 = vmatprep.subr.bf16.mxu0 %v1761_v4  ;;  %v1769_v12 = vld [vmem:[%s2335_s1 + $0x58] sm:$0xff]   ;;  %v1773_v16 = vld [vmem:[%s2335_s1 + $0x60] sm:$0xff]   ;;  %v1777_v20 = vld [vmem:[%s2335_s1 + $0x68] sm:$0xff]  }
   0x6   :  { %1605 = vmatprep.subr.bf16.mxu1 %v1762_v5  ;;  %v1770_v13 = vld [vmem:[%s2335_s1 + $0xd8] sm:$0xff]   ;;  %v1774_v17 = vld [vmem:[%s2335_s1 + $0xe0] sm:$0xff]   ;;  %v1778_v21 = vld [vmem:[%s2335_s1 + $0xe8] sm:$0xff]  }
   0x7   :  { %v1771_v14 = vld [vmem:[%s2335_s1 + $0x18] sm:$0xff]   ;;  %v1775_v18 = vld [vmem:[%s2335_s1 + $0x20] sm:$0xff]   ;;  %v1779_v22 = vld [vmem:[%s2335_s1 + $0x28] sm:$0xff]  }
   0x8   :  { %1584 = vmatpush3.bf16.msra.mxu0 %v1763_v6  ;;  %v1772_v15 = vld [vmem:[%s2335_s1 + $0x98] sm:$0xff]   ;;  %v1776_v19 = vld [vmem:[%s2335_s1 + $0xa0] sm:$0xff]   ;;  %v1780_v23 = vld [vmem:[%s2335_s1 + $0xa8] sm:$0xff]  }
   0x9   :  { %1606 = vmatpush3.bf16.msra.mxu1 %v1764_v7  ;;  %1585 = vmatprep.subr.bf16.mxu0 %v1765_v8  ;;  %v1781_v24 = vld [vmem:[%s2335_s1 + $0x70] sm:$0xff]   ;;  %v1785_v28 = vld [vmem:[%s2335_s1 + $0x78] sm:$0xff]   ;;  %v15_v32 = vld [vmem:[%s2336_s0] sm:$0xff] }
   0xa   :  { %1607 = vmatprep.subr.bf16.mxu1 %v1766_v9  ;;  %v1782_v25 = vld [vmem:[%s2335_s1 + $0xf0] sm:$0xff]   ;;  %v1786_v29 = vld [vmem:[%s2335_s1 + $0xf8] sm:$0xff]   ;;  %v16_v33 = vld [vmem:[%s2336_s0 + $0x8] sm:$0xff]  ;;  %v1437_v34 = vcombine.low %v15_v32, %v15_v32  ;;  %v1438_v35 = vcombine.high %v15_v32, %v15_v32 }
   0xb   :  { %v1783_v26 = vld [vmem:[%s2335_s1 + $0x30] sm:$0xff]   ;;  %v1787_v30 = vld [vmem:[%s2335_s1 + $0x38] sm:$0xff]   ;;  %v1439_v36 = vcombine.low %v16_v33, %v16_v33  ;;  %v1440_v37 = vcombine.high %v16_v33, %v16_v33  ;;  %v1793_v38 = vld [vmem:[%s2335_s1 + $0x140] sm:$0xff]  }
   0xc   :  { %1586 = vmatpush3.bf16.msra.mxu0 %v1767_v10  ;;  %v1784_v27 = vld [vmem:[%s2335_s1 + $0xb0] sm:$0xff]   ;;  %v1788_v31 = vld [vmem:[%s2335_s1 + $0xb8] sm:$0xff]   ;;  %v1794_v39 = vld [vmem:[%s2335_s1 + $0x1c0] sm:$0xff]   ;;  %1142 = vmatprep.mubr.bf16.mxu0 %v1438_v35 }
   0xd   :  { %1608 = vmatpush3.bf16.msra.mxu1 %v1768_v11  ;;  %1587 = vmatprep.subr.bf16.mxu0 %v1769_v12  ;;  %v1795_v40 = vld [vmem:[%s2335_s1 + $0x100] sm:$0xff]   ;;  %v1797_v42 = vld [vmem:[%s2335_s1 + $0x148] sm:$0xff]   ;;  %v1801_v46 = vld [vmem:[%s2335_s1 + $0x150] sm:$0xff]  }
   0xe   :  { %1609 = vmatprep.subr.bf16.mxu1 %v1770_v13  ;;  %1182 = vmatprep.mubr.bf16.mxu1 %v1440_v37  ;;  %v1796_v41 = vld [vmem:[%s2335_s1 + $0x180] sm:$0xff]   ;;  %v1798_v43 = vld [vmem:[%s2335_s1 + $0x1c8] sm:$0xff]   ;;  %v1802_v47 = vld [vmem:[%s2335_s1 + $0x1d0] sm:$0xff]  }
   0xf   :  { %v1799_v44 = vld [vmem:[%s2335_s1 + $0x108] sm:$0xff]   ;;  %v1803_v48 = vld [vmem:[%s2335_s1 + $0x110] sm:$0xff]   ;;  %v1805_v50 = vld [vmem:[%s2335_s1 + $0x158] sm:$0xff]  }
  0x10   :  { %1588 = vmatpush3.bf16.msra.mxu0 %v1771_v14  ;;  %v1800_v45 = vld [vmem:[%s2335_s1 + $0x188] sm:$0xff]   ;;  %v1804_v49 = vld [vmem:[%s2335_s1 + $0x190] sm:$0xff]   ;;  %v1806_v51 = vld [vmem:[%s2335_s1 + $0x1d8] sm:$0xff]  }
  0x11   :  { %1610 = vmatpush3.bf16.msra.mxu1 %v1772_v15  ;;  %1589 = vmatprep.subr.bf16.mxu0 %v1773_v16  ;;  %v1807_v52 = vld [vmem:[%s2335_s1 + $0x118] sm:$0xff]   ;;  %v1809_v54 = vld [vmem:[%s2335_s1 + $0x160] sm:$0xff]   ;;  %v1813_v58 = vld [vmem:[%s2335_s1 + $0x168] sm:$0xff]  }
  0x12   :  { %1611 = vmatprep.subr.bf16.mxu1 %v1774_v17  ;;  %v1808_v53 = vld [vmem:[%s2335_s1 + $0x198] sm:$0xff]   ;;  %v1810_v55 = vld [vmem:[%s2335_s1 + $0x1e0] sm:$0xff]   ;;  %v1814_v59 = vld [vmem:[%s2335_s1 + $0x1e8] sm:$0xff]  }
  0x13   :  { %v1811_v56 = vld [vmem:[%s2335_s1 + $0x120] sm:$0xff]   ;;  %v1815_v60 = vld [vmem:[%s2335_s1 + $0x128] sm:$0xff]   ;;  %v1817_v62 = vld [vmem:[%s2335_s1 + $0x170] sm:$0xff]  }
  0x14   :  { %1590 = vmatpush3.bf16.msra.mxu0 %v1775_v18  ;;  %v1812_v57 = vld [vmem:[%s2335_s1 + $0x1a0] sm:$0xff]   ;;  %v1816_v61 = vld [vmem:[%s2335_s1 + $0x1a8] sm:$0xff]   ;;  %v1818_v63 = vld [vmem:[%s2335_s1 + $0x1f0] sm:$0xff]  }
  0x15   :  { %1612 = vmatpush3.bf16.msra.mxu1 %v1776_v19  ;;  %1591 = vmatprep.subr.bf16.mxu0 %v1777_v20  ;;  %v1819_v0 = vld [vmem:[%s2335_s1 + $0x130] sm:$0xff]   ;;  %v1821_v2 = vld [vmem:[%s2335_s1 + $0x178] sm:$0xff]   ;;  %v1829_v12 = vld [vmem:[%s2335_s1 + $0x240] sm:$0xff]  }
  0x16   :  { %1613 = vmatprep.subr.bf16.mxu1 %v1778_v21  ;;  %v1820_v1 = vld [vmem:[%s2335_s1 + $0x1b0] sm:$0xff]   ;;  %v1822_v3 = vld [vmem:[%s2335_s1 + $0x1f8] sm:$0xff]   ;;  %v1830_v13 = vld [vmem:[%s2335_s1 + $0x2c0] sm:$0xff]  }
  0x17   :  { %v1823_v4 = vld [vmem:[%s2335_s1 + $0x138] sm:$0xff]   ;;  %v17_v6 = vld [vmem:[%s2336_s0 + $0x10] sm:$0xff]  ;;  %v1831_v14 = vld [vmem:[%s2335_s1 + $0x200] sm:$0xff]  }
  0x18   :  { %1592 = vmatpush3.bf16.msra.mxu0 %v1779_v22  ;;  %v1824_v5 = vld [vmem:[%s2335_s1 + $0x1b8] sm:$0xff]   ;;  %v1441_v7 = vcombine.low %v17_v6, %v17_v6  ;;  %v1442_v8 = vcombine.high %v17_v6, %v17_v6  ;;  %v1832_v15 = vld [vmem:[%s2335_s1 + $0x280] sm:$0xff]   ;;  %v1833_v16 = vld [vmem:[%s2335_s1 + $0x248] sm:$0xff]  }
  0x19   :  { %1614 = vmatpush3.bf16.msra.mxu1 %v1780_v23  ;;  %1593 = vmatprep.subr.bf16.mxu0 %v1781_v24  ;;  %v18_v9 = vld [vmem:[%s2336_s0 + $0x18] sm:$0xff]  ;;  %v1834_v17 = vld [vmem:[%s2335_s1 + $0x2c8] sm:$0xff]   ;;  %v1837_v20 = vld [vmem:[%s2335_s1 + $0x250] sm:$0xff]  }
  0x1a   :  { %1615 = vmatprep.subr.bf16.mxu1 %v1782_v25  ;;  %v1443_v10 = vcombine.low %v18_v9, %v18_v9  ;;  %v1444_v11 = vcombine.high %v18_v9, %v18_v9  ;;  %v1835_v18 = vld [vmem:[%s2335_s1 + $0x208] sm:$0xff]   ;;  %v1838_v21 = vld [vmem:[%s2335_s1 + $0x2d0] sm:$0xff]   ;;  %v1841_v24 = vld [vmem:[%s2335_s1 + $0x258] sm:$0xff]  }
  0x1b   :  { %v1836_v19 = vld [vmem:[%s2335_s1 + $0x288] sm:$0xff]   ;;  %v1839_v22 = vld [vmem:[%s2335_s1 + $0x210] sm:$0xff]   ;;  %v1842_v25 = vld [vmem:[%s2335_s1 + $0x2d8] sm:$0xff]  }
  0x1c   :  { %1594 = vmatpush3.bf16.msra.mxu0 %v1783_v26  ;;  %v1840_v23 = vld [vmem:[%s2335_s1 + $0x290] sm:$0xff]   ;;  %v1843_v26 = vld [vmem:[%s2335_s1 + $0x218] sm:$0xff]   ;;  %v1849_v32 = vld [vmem:[%s2335_s1 + $0x268] sm:$0xff]  }
  0x1d   :  { %1616 = vmatpush3.bf16.msra.mxu1 %v1784_v27  ;;  %1595 = vmatprep.subr.bf16.mxu0 %v1785_v28  ;;  %v1844_v27 = vld [vmem:[%s2335_s1 + $0x298] sm:$0xff]   ;;  %v1845_v28 = vld [vmem:[%s2335_s1 + $0x260] sm:$0xff]   ;;  %v1850_v33 = vld [vmem:[%s2335_s1 + $0x2e8] sm:$0xff]  }
  0x1e   :  { %1617 = vmatprep.subr.bf16.mxu1 %v1786_v29  ;;  %v1846_v29 = vld [vmem:[%s2335_s1 + $0x2e0] sm:$0xff]   ;;  %v1852_v35 = vld [vmem:[%s2335_s1 + $0x2a8] sm:$0xff]   ;;  %v1854_v37 = vld [vmem:[%s2335_s1 + $0x2f0] sm:$0xff]  }
  0x1f   :  { %v1885_v6 = vld [vmem:[%s2335_s1 + $0x368] sm:$0xff]  }
  0x20   :  { %1596 = vmatpush3.bf16.msra.mxu0 %v1787_v30  ;;  %v1847_v30 = vld [vmem:[%s2335_s1 + $0x220] sm:$0xff]   ;;  %v1888_v9 = vld [vmem:[%s2335_s1 + $0x3a8] sm:$0xff]  }
  0x21   :  { %1618 = vmatpush3.bf16.msra.mxu1 %v1788_v31  ;;  %1625 = vmatprep.subr.bf16.mxu0 %v1793_v38  ;;  %v1848_v31 = vld [vmem:[%s2335_s1 + $0x2a0] sm:$0xff]   ;;  %v1855_v38 = vld [vmem:[%s2335_s1 + $0x230] sm:$0xff]  }
  0x22   :  { %1647 = vmatprep.subr.bf16.mxu1 %v1794_v39  ;;  %v1856_v39 = vld [vmem:[%s2335_s1 + $0x2b0] sm:$0xff]  }
  0x23   :  { %1143 = vmatmul.mubr.bf16.vlgmr.msra.gmra.mrb[0].mxu0 %v1437_v34  ;;  %v1851_v34 = vld [vmem:[%s2335_s1 + $0x228] sm:$0xff]  }
  0x24   :  { %1183 = vmatmul.mubr.bf16.vlgmr.msra.gmra.mrb[0].mxu1 %v1439_v36  ;;  %1626 = vmatpush3.bf16.msra.mxu0 %v1795_v40  ;;  %v1853_v36 = vld [vmem:[%s2335_s1 + $0x270] sm:$0xff]   ;;  %v1857_v40 = vld [vmem:[%s2335_s1 + $0x278] sm:$0xff]  }
  0x25   :  { %1648 = vmatpush3.bf16.msra.mxu1 %v1796_v41  ;;  %1627 = vmatprep.subr.bf16.mxu0 %v1797_v42  ;;  %v1858_v41 = vld [vmem:[%s2335_s1 + $0x2f8] sm:$0xff]  }
  0x26   :  { %1649 = vmatprep.subr.bf16.mxu1 %v1798_v43  ;;  %1222 = vmatprep.mubr.bf16.mxu0 %v1442_v8  ;;  %v1859_v42 = vld [vmem:[%s2335_s1 + $0x238] sm:$0xff]   ;;  %v1887_v8 = vld [vmem:[%s2335_s1 + $0x328] sm:$0xff]  }
  0x27   :  { %1262 = vmatprep.mubr.bf16.mxu1 %v1444_v11  ;;  %v1860_v43 = vld [vmem:[%s2335_s1 + $0x2b8] sm:$0xff]   ;;  %v1890_v11 = vld [vmem:[%s2335_s1 + $0x3f0] sm:$0xff]  }
  0x28   :  { %1628 = vmatpush3.bf16.msra.mxu0 %v1799_v44  ;;  %v19_v44 = vld [vmem:[%s2336_s0 + $0x20] sm:$0xff] }
  0x29   :  { %1650 = vmatpush3.bf16.msra.mxu1 %v1800_v45  ;;  %1629 = vmatprep.subr.bf16.mxu0 %v1801_v46  ;;  %v20_v45 = vld [vmem:[%s2336_s0 + $0x28] sm:$0xff]  ;;  %v1445_v46 = vcombine.low %v19_v44, %v19_v44 }
  0x2a   :  { %1651 = vmatprep.subr.bf16.mxu1 %v1802_v47  ;;  %v1446_v47 = vcombine.high %v19_v44, %v19_v44 }
  0x2c   :  { %1630 = vmatpush3.bf16.msra.mxu0 %v1803_v48  ;;  %v1447_v48 = vcombine.low %v20_v45, %v20_v45 }
  0x2d   :  { %1652 = vmatpush3.bf16.msra.mxu1 %v1804_v49  ;;  %1631 = vmatprep.subr.bf16.mxu0 %v1805_v50  ;;  %v1448_v49 = vcombine.high %v20_v45, %v20_v45  ;;  %v1865_v50 = vld [vmem:[%s2335_s1 + $0x340] sm:$0xff]  }
  0x2e   :  { %1653 = vmatprep.subr.bf16.mxu1 %v1806_v51  ;;  %v1866_v51 = vld [vmem:[%s2335_s1 + $0x3c0] sm:$0xff]  }
  0x30   :  { %1632 = vmatpush3.bf16.msra.mxu0 %v1807_v52  ;;  %v1867_v52 = vld [vmem:[%s2335_s1 + $0x300] sm:$0xff]  }
  0x31   :  { %1654 = vmatpush3.bf16.msra.mxu1 %v1808_v53  ;;  %1633 = vmatprep.subr.bf16.mxu0 %v1809_v54  ;;  %v1868_v53 = vld [vmem:[%s2335_s1 + $0x380] sm:$0xff]   ;;  %v1869_v54 = vld [vmem:[%s2335_s1 + $0x348] sm:$0xff]  }
  0x32   :  { %1655 = vmatprep.subr.bf16.mxu1 %v1810_v55  ;;  %v1870_v55 = vld [vmem:[%s2335_s1 + $0x3c8] sm:$0xff]  }
  0x34   :  { %1634 = vmatpush3.bf16.msra.mxu0 %v1811_v56  ;;  %v1871_v56 = vld [vmem:[%s2335_s1 + $0x308] sm:$0xff]  }
  0x35   :  { %1656 = vmatpush3.bf16.msra.mxu1 %v1812_v57  ;;  %1635 = vmatprep.subr.bf16.mxu0 %v1813_v58  ;;  %v1872_v57 = vld [vmem:[%s2335_s1 + $0x388] sm:$0xff]   ;;  %v1873_v58 = vld [vmem:[%s2335_s1 + $0x350] sm:$0xff]  }
  0x36   :  { %1657 = vmatprep.subr.bf16.mxu1 %v1814_v59  ;;  %v1874_v59 = vld [vmem:[%s2335_s1 + $0x3d0] sm:$0xff]  }
  0x38   :  { %1636 = vmatpush3.bf16.msra.mxu0 %v1815_v60  ;;  %v1875_v60 = vld [vmem:[%s2335_s1 + $0x310] sm:$0xff]  }
  0x39   :  { %1658 = vmatpush3.bf16.msra.mxu1 %v1816_v61  ;;  %1637 = vmatprep.subr.bf16.mxu0 %v1817_v62  ;;  %v1876_v61 = vld [vmem:[%s2335_s1 + $0x390] sm:$0xff]   ;;  %v1877_v62 = vld [vmem:[%s2335_s1 + $0x358] sm:$0xff]  }
  0x3a   :  { %1659 = vmatprep.subr.bf16.mxu1 %v1818_v63  ;;  %v1878_v63 = vld [vmem:[%s2335_s1 + $0x3d8] sm:$0xff]  }
  0x3c   :  { %1638 = vmatpush3.bf16.msra.mxu0 %v1819_v0  ;;  %v1879_v0 = vld [vmem:[%s2335_s1 + $0x318] sm:$0xff]  }
  0x3d   :  { %1660 = vmatpush3.bf16.msra.mxu1 %v1820_v1  ;;  %1639 = vmatprep.subr.bf16.mxu0 %v1821_v2  ;;  %v1880_v1 = vld [vmem:[%s2335_s1 + $0x398] sm:$0xff]   ;;  %v1881_v2 = vld [vmem:[%s2335_s1 + $0x360] sm:$0xff]  }
  0x3e   :  { %1661 = vmatprep.subr.bf16.mxu1 %v1822_v3  ;;  %v1882_v3 = vld [vmem:[%s2335_s1 + $0x3e0] sm:$0xff]  }
  0x40   :  { %1640 = vmatpush3.bf16.msra.mxu0 %v1823_v4  ;;  %v1883_v4 = vld [vmem:[%s2335_s1 + $0x320] sm:$0xff]  }
  0x41   :  { %1662 = vmatpush3.bf16.msra.mxu1 %v1824_v5  ;;  %1669 = vmatprep.subr.bf16.mxu0 %v1829_v12  ;;  %v1884_v5 = vld [vmem:[%s2335_s1 + $0x3a0] sm:$0xff]   ;;  %v1891_v12 = vld [vmem:[%s2335_s1 + $0x330] sm:$0xff]  }
  0x42   :  { %1691 = vmatprep.subr.bf16.mxu1 %v1830_v13  ;;  %v1892_v13 = vld [vmem:[%s2335_s1 + $0x3b0] sm:$0xff]  }
  0x43   :  { %1223 = vmatmul.mubr.bf16.vlgmr.msra.gmra.mrb[4].mxu0 %v1441_v7  ;;  %v1886_v7 = vld [vmem:[%s2335_s1 + $0x3e8] sm:$0xff]  }
  0x44   :  { %1263 = vmatmul.mubr.bf16.vlgmr.msra.gmra.mrb[4].mxu1 %v1443_v10  ;;  %1670 = vmatpush3.bf16.msra.mxu0 %v1831_v14  ;;  %v1889_v10 = vld [vmem:[%s2335_s1 + $0x370] sm:$0xff]   ;;  %v1893_v14 = vld [vmem:[%s2335_s1 + $0x378] sm:$0xff]  }
  0x45   :  { %1692 = vmatpush3.bf16.msra.mxu1 %v1832_v15  ;;  %1671 = vmatprep.subr.bf16.mxu0 %v1833_v16  ;;  %v1894_v15 = vld [vmem:[%s2335_s1 + $0x3f8] sm:$0xff]  }
  0x46   :  { %1693 = vmatprep.subr.bf16.mxu1 %v1834_v17  ;;  %1302 = vmatprep.mubr.bf16.mxu0 %v1446_v47  ;;  %v1895_v16 = vld [vmem:[%s2335_s1 + $0x338] sm:$0xff]  }
  0x47   :  { %1342 = vmatprep.mubr.bf16.mxu1 %v1448_v49  ;;  %v1896_v17 = vld [vmem:[%s2335_s1 + $0x3b8] sm:$0xff]  }
  0x48   :  { %1672 = vmatpush3.bf16.msra.mxu0 %v1835_v18  ;;  %v21_v18 = vld [vmem:[%s2336_s0 + $0x30] sm:$0xff] }
  0x49   :  { %1694 = vmatpush3.bf16.msra.mxu1 %v1836_v19  ;;  %1673 = vmatprep.subr.bf16.mxu0 %v1837_v20  ;;  %v22_v19 = vld [vmem:[%s2336_s0 + $0x38] sm:$0xff]  ;;  %v1449_v20 = vcombine.low %v21_v18, %v21_v18 }
  0x4a   :  { %1695 = vmatprep.subr.bf16.mxu1 %v1838_v21  ;;  %v1450_v21 = vcombine.high %v21_v18, %v21_v18 }
  0x4c   :  { %1674 = vmatpush3.bf16.msra.mxu0 %v1839_v22  ;;  %v1451_v22 = vcombine.low %v22_v19, %v22_v19 }
  0x4d   :  { %1696 = vmatpush3.bf16.msra.mxu1 %v1840_v23  ;;  %1675 = vmatprep.subr.bf16.mxu0 %v1841_v24  ;;  %v1452_v23 = vcombine.high %v22_v19, %v22_v19 }
  0x4e   :  { %1697 = vmatprep.subr.bf16.mxu1 %v1842_v25 }
  0x50   :  { %1676 = vmatpush3.bf16.msra.mxu0 %v1843_v26  ;;  %v1436_v26 = vld [vmem:[%s2337_s2] ss:$0 sm:$0xff] }
  0x51   :  { %1698 = vmatpush3.bf16.msra.mxu1 %v1844_v27  ;;  %1677 = vmatprep.subr.bf16.mxu0 %v1845_v28 }
  0x52   :  { %1699 = vmatprep.subr.bf16.mxu1 %v1846_v29 }
  0x54   :  { %1678 = vmatpush3.bf16.msra.mxu0 %v1847_v30 }
  0x55   :  { %1700 = vmatpush3.bf16.msra.mxu1 %v1848_v31  ;;  %1679 = vmatprep.subr.bf16.mxu0 %v1849_v32 }
  0x56   :  { %1701 = vmatprep.subr.bf16.mxu1 %v1850_v33 }
  0x58   :  { %1680 = vmatpush3.bf16.msra.mxu0 %v1851_v34 }
  0x59   :  { %1702 = vmatpush3.bf16.msra.mxu1 %v1852_v35  ;;  %1681 = vmatprep.subr.bf16.mxu0 %v1853_v36 }
  0x5a   :  { %1703 = vmatprep.subr.bf16.mxu1 %v1854_v37 }
  0x5c   :  { %1682 = vmatpush3.bf16.msra.mxu0 %v1855_v38 }
  0x5d   :  { %1704 = vmatpush3.bf16.msra.mxu1 %v1856_v39  ;;  %1683 = vmatprep.subr.bf16.mxu0 %v1857_v40 }
  0x5e   :  { %1705 = vmatprep.subr.bf16.mxu1 %v1858_v41 }
  0x60   :  { %1684 = vmatpush3.bf16.msra.mxu0 %v1859_v42 }
  0x61   :  { %1706 = vmatpush3.bf16.msra.mxu1 %v1860_v43  ;;  %1713 = vmatprep.subr.bf16.mxu0 %v1865_v50 }
  0x62   :  { %1735 = vmatprep.subr.bf16.mxu1 %v1866_v51 }
  0x63   :  { %1303 = vmatmul.mubr.bf16.vlgmr.msra.gmra.mrb[8].mxu0 %v1445_v46 }
  0x64   :  { %1343 = vmatmul.mubr.bf16.vlgmr.msra.gmra.mrb[8].mxu1 %v1447_v48  ;;  %1714 = vmatpush3.bf16.msra.mxu0 %v1867_v52 }
  0x65   :  { %1736 = vmatpush3.bf16.msra.mxu1 %v1868_v53  ;;  %1715 = vmatprep.subr.bf16.mxu0 %v1869_v54 }
  0x66   :  { %1737 = vmatprep.subr.bf16.mxu1 %v1870_v55  ;;  %1382 = vmatprep.mubr.bf16.mxu0 %v1450_v21 }
  0x67   :  { %1422 = vmatprep.mubr.bf16.mxu1 %v1452_v23 }
  0x68   :  { %1716 = vmatpush3.bf16.msra.mxu0 %v1871_v56 }
  0x69   :  { %1738 = vmatpush3.bf16.msra.mxu1 %v1872_v57  ;;  %1717 = vmatprep.subr.bf16.mxu0 %v1873_v58 }
  0x6a   :  { %1739 = vmatprep.subr.bf16.mxu1 %v1874_v59 }
  0x6c   :  { %1718 = vmatpush3.bf16.msra.mxu0 %v1875_v60 }
  0x6d   :  { %1740 = vmatpush3.bf16.msra.mxu1 %v1876_v61  ;;  %1719 = vmatprep.subr.bf16.mxu0 %v1877_v62 }
  0x6e   :  { %1741 = vmatprep.subr.bf16.mxu1 %v1878_v63 }
  0x70   :  { %1720 = vmatpush3.bf16.msra.mxu0 %v1879_v0 }
  0x71   :  { %1742 = vmatpush3.bf16.msra.mxu1 %v1880_v1  ;;  %1721 = vmatprep.subr.bf16.mxu0 %v1881_v2 }
  0x72   :  { %1743 = vmatprep.subr.bf16.mxu1 %v1882_v3 }
  0x74   :  { %1722 = vmatpush3.bf16.msra.mxu0 %v1883_v4 }
  0x75   :  { %1744 = vmatpush3.bf16.msra.mxu1 %v1884_v5  ;;  %1723 = vmatprep.subr.bf16.mxu0 %v1885_v6 }
  0x76   :  { %1745 = vmatprep.subr.bf16.mxu1 %v1886_v7 }
  0x78   :  { %1724 = vmatpush3.bf16.msra.mxu0 %v1887_v8 }
  0x79   :  { %1746 = vmatpush3.bf16.msra.mxu1 %v1888_v9  ;;  %1725 = vmatprep.subr.bf16.mxu0 %v1889_v10 }
  0x7a   :  { %1747 = vmatprep.subr.bf16.mxu1 %v1890_v11 }
  0x7c   :  { %1726 = vmatpush3.bf16.msra.mxu0 %v1891_v12 }
  0x7d   :  { %1748 = vmatpush3.bf16.msra.mxu1 %v1892_v13  ;;  %1727 = vmatprep.subr.bf16.mxu0 %v1893_v14 }
  0x7e   :  { %1749 = vmatprep.subr.bf16.mxu1 %v1894_v15 }
  0x80   :  { %1728 = vmatpush3.bf16.msra.mxu0 %v1895_v16 }
  0x81   :  { %1750 = vmatpush3.bf16.msra.mxu1 %v1896_v17 }
  0x83   :  { %1383 = vmatmul.mubr.bf16.vlgmr.msra.gmra.mrb[12].mxu0 %v1449_v20 }
  0x84   :  { %1423 = vmatmul.mubr.bf16.vlgmr.msra.gmra.mrb[12].mxu1 %v1451_v22 }
  0xf6   :  { %v1597_v24 = vpop.f32.mrb[0].mxu0 }
  0xf7   :  { %v1619_v25 = vpop.f32.mrb[0].mxu1  ;;  %v1598_v27 = vpop.f32.mrb[1].mxu0 }
  0xf8   :  { %v1620_v28 = vpop.f32.mrb[1].mxu1  ;;  %v1599_v29 = vadd.f32 %v1598_v27, %v1597_v24  ;;  %v1600_v31 = vpop.f32.mrb[2].mxu0 }
  0xf9   :  { %v1621_v30 = vadd.f32 %v1620_v28, %v1619_v25  ;;  %v1622_v32 = vpop.f32.mrb[2].mxu1  ;;  %v1601_v33 = vpop.f32.mrb[3].mxu0 }
  0xfa   :  { %v1623_v34 = vpop.f32.mrb[3].mxu1  ;;  %v1145_v35 = vadd.f32 %v1599_v29, %v1436_v26 }
  0xfc   :  { %v1185_v36 = vadd.f32 %v1621_v30, %v1145_v35 }
 0x116   :  { %v1641_v37 = vpop.f32.mrb[4].mxu0 }
 0x117   :  { %v1663_v38 = vpop.f32.mrb[4].mxu1  ;;  %v1642_v39 = vpop.f32.mrb[5].mxu0 }
 0x118   :  { %v1664_v40 = vpop.f32.mrb[5].mxu1  ;;  %v1643_v41 = vadd.f32 %v1642_v39, %v1641_v37  ;;  %v1644_v43 = vpop.f32.mrb[6].mxu0 }
 0x119   :  { %v1665_v42 = vadd.f32 %v1664_v40, %v1663_v38  ;;  %v1666_v44 = vpop.f32.mrb[6].mxu1  ;;  %v1645_v45 = vpop.f32.mrb[7].mxu0 }
 0x11a   :  { %v1667_v46 = vpop.f32.mrb[7].mxu1  ;;  %v1225_v47 = vadd.f32 %v1643_v41, %v1185_v36 }
 0x11c   :  { %v1265_v48 = vadd.f32 %v1665_v42, %v1225_v47 }
 0x136   :  { %v1685_v49 = vpop.f32.mrb[8].mxu0 }
 0x137   :  { %v1707_v50 = vpop.f32.mrb[8].mxu1  ;;  %v1686_v51 = vpop.f32.mrb[9].mxu0 }
 0x138   :  { %v1687_v52 = vadd.f32 %v1686_v51, %v1685_v49  ;;  %v1708_v53 = vpop.f32.mrb[9].mxu1  ;;  %v1688_v54 = vpop.f32.mrb[10].mxu0 }
 0x139   :  { %v1709_v55 = vadd.f32 %v1708_v53, %v1707_v50  ;;  %v1710_v56 = vpop.f32.mrb[10].mxu1  ;;  %v1689_v57 = vpop.f32.mrb[11].mxu0 }
 0x13a   :  { %v1305_v58 = vadd.f32 %v1687_v52, %v1265_v48  ;;  %v1711_v59 = vpop.f32.mrb[11].mxu1 }
 0x13c   :  { %v1345_v60 = vadd.f32 %v1709_v55, %v1305_v58 }
 0x156   :  { %v1729_v61 = vpop.f32.mrb[12].mxu0 }
 0x157   :  { %v1751_v62 = vpop.f32.mrb[12].mxu1  ;;  %v1730_v63 = vpop.f32.mrb[13].mxu0 }
 0x158   :  { %v1731_v0 = vadd.f32 %v1730_v63, %v1729_v61  ;;  %v1752_v1 = vpop.f32.mrb[13].mxu1  ;;  %v1732_v2 = vpop.f32.mrb[14].mxu0 }
 0x159   :  { %v1753_v3 = vadd.f32 %v1752_v1, %v1751_v62  ;;  %v1754_v4 = vpop.f32.mrb[14].mxu1  ;;  %v1733_v5 = vpop.f32.mrb[15].mxu0 }
 0x15a   :  { %v1385_v6 = vadd.f32 %v1731_v0, %v1345_v60  ;;  %v1755_v7 = vpop.f32.mrb[15].mxu1 }
 0x15c   :  { %v1425_v8 = vadd.f32 %v1753_v3, %v1385_v6 }
 0x15e   :  { %1431 = vst.msk [vmem:[%s2338_s3] sm:$0xff] %vm1430_vm0, %v1425_v8 }

</bundles_post_ra>
